<compile_context>
chip_gen: v7x
topology: tpu7x:2x2x1
jax: 0.10.0
libtpu: 0.0.40
codegen_flags: <defaults>
</compile_context>

<pallas_src>
import numpy as np
import jax
import jax.numpy as jnp
from jax.experimental import pallas as pl
from jax.experimental.pallas import tpu as pltpu


CO1 = 64    # conv1 output channels
CO2 = 128   # conv2 output channels


# ----------------------------------------------------------------------------
# Fused kernel builder (B, L, Cin, OUT are static Python ints).
# ----------------------------------------------------------------------------
def _make_kernel(B, L, Cin, OUT):
    n = B * L          # full-resolution rows; row r = b*L + l
    R = B // 2         # FC rows (the source model folds 2 samples per row)
    assert L % 4 == 0 and B % 2 == 0
    assert n % 8 == 0 and (2 * L) % 8 == 0       # 8-row (sublane) aligned blocks

    def kernel(x_ref, w1_ref, b1_ref, w2_ref, b2_ref, wfc_ref, bfc_ref, o_ref):
        x = x_ref[...]                                        # (n, Cin) f32

        # ---- position bookkeeping: ONE iota, all masks derived from it -----
        l_idx = jax.lax.broadcasted_iota(jnp.int32, (n, 1), 0) % L
        not_first = l_idx != 0            # position l-1 exists (conv1 pad)
        not_last = l_idx != L - 1         # position l+1 exists (conv1 pad)
        l_even = (l_idx % 2) == 0         # parity within the pool-1 pair
        j_not_first = l_idx >= 2          # pooled position j-1 exists (conv2 pad)
        j_not_last = l_idx < L - 2        # pooled position j+1 exists (conv2 pad)

        def conv3(left, center, right, w_ref, b_ref):
            # 3-tap conv as 3 matmuls; each tap weight pushed to the MXU once.
            y = (jnp.dot(left, w_ref[0], preferred_element_type=jnp.float32)
                 + jnp.dot(center, w_ref[1], preferred_element_type=jnp.float32)
                 + jnp.dot(right, w_ref[2], preferred_element_type=jnp.float32))
            return jnp.maximum(y + b_ref[...], 0.0)

        # ---- layer 1: conv(k=3, pad=1) + bias + ReLU at every position -----
        xm = jnp.where(not_first, pltpu.roll(x, shift=1, axis=0), 0.0)       # x[l-1]
        xp = jnp.where(not_last, pltpu.roll(x, shift=n - 1, axis=0), 0.0)    # x[l+1]
        c1 = conv3(xm, x, xp, w1_ref, b1_ref)                 # (n, 64)

        # ---- maxpool(2) #1, kept replicated at full resolution --------------
        # p1[b*L + l] == pool1[b, l // 2]   (both rows of a pool pair equal)
        p1 = jnp.where(l_even,
                       jnp.maximum(c1, pltpu.roll(c1, shift=n - 1, axis=0)),
                       jnp.maximum(c1, pltpu.roll(c1, shift=1, axis=0)))

        # ---- layer 2: conv(k=3, pad=1) + bias + ReLU on the pooled sequence -
        p1m = jnp.where(j_not_first, pltpu.roll(p1, shift=2, axis=0), 0.0)       # pool1[j-1]
        p1p = jnp.where(j_not_last, pltpu.roll(p1, shift=n - 2, axis=0), 0.0)    # pool1[j+1]
        c2 = conv3(p1m, p1, p1p, w2_ref, b2_ref)              # (n, 128), replicated in pairs

        # ---- maxpool(2) #2 ---------------------------------------------------
        # Only rows with l % 4 == 0 are consumed by the FC below (the expanded
        # FC weight is exactly zero everywhere else), so one forward max is
        # enough:  h2[b*L + 4*q] == pool2[b, q].
        h2 = jnp.maximum(c2, pltpu.roll(c2, shift=n - 2, axis=0))

        # ---- flatten + fully connected: VPU multiplies + reduces (no MXU) ----
        # wfc_ref[o] is (2L, CO2): fc1.weight expanded to the kernel's row
        # layout (torch-contiguous (sample, channel, pos) flatten order),
        # zero at the 3 replicated rows of every group of 4.
        rows = []
        for r in range(R):                                     # static, R = B // 2
            blk = h2[r * 2 * L:(r + 1) * 2 * L, :]             # (2L, CO2), 8-row aligned
            cols = [jnp.sum(blk * wfc_ref[o], axis=1, keepdims=True)
                    for o in range(OUT)]                       # each (2L, 1)
            g = jnp.concatenate(cols, axis=1)                  # (2L, OUT)
            rows.append(jnp.sum(g, axis=0, keepdims=True))     # (1, OUT)
        out = rows[0] if R == 1 else jnp.concatenate(rows, axis=0)
        o_ref[...] = (out + bfc_ref[...]).astype(o_ref.dtype)

    return kernel


# ----------------------------------------------------------------------------
# One-time parameter preparation (hoisted out of the forward path).
# ----------------------------------------------------------------------------
def prepare_params(w1, b1, w2, b2, wfc, bfc, *, input_size):
    """Convert PyTorch parameter layouts to kernel layouts (run once).

    w1: (64, Cin, 3),  b1: (64,)   -- nn.Conv1d(Cin, 64, 3, padding=1)
    w2: (128, 64, 3),  b2: (128,)  -- nn.Conv1d(64, 128, 3, padding=1)
    wfc: (OUT, 128 * (input_size // 2)),  bfc: (OUT,)  -- nn.Linear
    """
    L = input_size
    L4 = L // 4
    OUT, fc_in = wfc.shape
    assert fc_in == CO2 * (L // 2)

    w1k = jnp.transpose(w1, (2, 1, 0)).astype(jnp.float32)     # (3, Cin, 64)  tap-major
    w2k = jnp.transpose(w2, (2, 1, 0)).astype(jnp.float32)     # (3, 64, 128)
    b1k = b1.reshape(1, CO1).astype(jnp.float32)
    b2k = b2.reshape(1, CO2).astype(jnp.float32)
    bfck = bfc.reshape(1, OUT).astype(jnp.float32)

    # Expand fc1.weight over the kernel's full-resolution rows:
    #   torch flatten column  s*512 + c*4 + pos  ->  row  s*L + 4*pos,  lane c
    # and exact zeros at the 3 replicated rows (d = 1..3) of every group of 4.
    wfc_r = wfc.reshape(OUT, 2, CO2, L4)                        # (o, s, c, pos)
    wfc_r = jnp.transpose(wfc_r, (0, 1, 3, 2)).astype(jnp.float32)  # (o, s, pos, c)
    wfck = jnp.zeros((OUT, 2, L4, 4, CO2), jnp.float32)
    wfck = wfck.at[:, :, :, 0, :].set(wfc_r)
    wfck = wfck.reshape(OUT, 2 * L, CO2)                        # row = s*L + 4*pos + d

    return (w1k, b1k, w2k, b2k, wfck, bfck)


# ----------------------------------------------------------------------------
# Forward wrapper: one transpose + one fused pallas_call.
# ----------------------------------------------------------------------------
def convnet_forward(x_ncl, params):
    """x_ncl: (B, Cin, L) float32 (PyTorch NCL).  Returns (B//2, OUT)."""
    w1k, b1k, w2k, b2k, wfck, bfck = params
    B, Cin, L = x_ncl.shape
    OUT = bfck.shape[1]
    R = B // 2

    kernel = _make_kernel(B, L, Cin, OUT)

    # Single per-call layout op: NCL -> row-major (B*L, Cin); the following
    # reshape is free and the whole thing fuses with the launch under jit.
    x_rows = jnp.transpose(x_ncl, (0, 2, 1)).reshape(B * L, Cin)

    vmem = pl.BlockSpec(memory_space=pltpu.MemorySpace.VMEM)
    return pl.pallas_call(
        kernel,
        out_shape=jax.ShapeDtypeStruct((R, OUT), jnp.float32),
        in_specs=[vmem] * 7,
        out_specs=vmem,
        # TODO(synk): if batch grows, add a grid over FC rows with
        # dimension_semantics=("parallel",) so v7x's two TensorCores both work.
    )(x_rows, w1k, b1k, w2k, b2k, wfck, bfck)


# ----------------------------------------------------------------------------
# Pure-JAX reference (PyTorch layouts / NCL) for validation.
# ----------------------------------------------------------------------------
def ref_forward(x_ncl, w1, b1, w2, b2, wfc, bfc):
    def conv1d(x, w, b):   # x: (B, C, L); w: (Co, Ci, K) torch layout
        y = jax.lax.conv_general_dilated(
            x, w, window_strides=(1,), padding=[(1, 1)],
            dimension_numbers=("NCH", "OIH", "NCH"),
            precision=jax.lax.Precision.HIGHEST)
        return y + b[None, :, None]

    def pool(x):
        Bx, C, Lx = x.shape
        return jnp.max(x.reshape(Bx, C, Lx // 2, 2), axis=-1)

    h = pool(jax.nn.relu(conv1d(x_ncl, w1, b1)))
    h = pool(jax.nn.relu(conv1d(h, w2, b2)))
    flat = h.reshape(-1, wfc.shape[1])       # intended view(-1, 128*(L//2))
    return jnp.dot(flat, wfc.T, precision=jax.lax.Precision.HIGHEST) + bfc


if __name__ == "__main__":
    # input_channels=4, input_size=16, output_size=8, batch=2
    B, Cin, L, OUT = 2, 4, 16, 8

    key = jax.random.PRNGKey(0)
    kx, k1, k2, k3, k4, k5, k6 = jax.random.split(key, 7)

    x = jax.random.normal(kx, (B, Cin, L), dtype=jnp.float32)

    # Deterministic synthetic parameters in PyTorch layouts.
    w1 = jax.random.normal(k1, (CO1, Cin, 3), dtype=jnp.float32) * 0.10
    b1 = jax.random.normal(k2, (CO1,), dtype=jnp.float32) * 0.10
    w2 = jax.random.normal(k3, (CO2, CO1, 3), dtype=jnp.float32) * 0.05
    b2 = jax.random.normal(k4, (CO2,), dtype=jnp.float32) * 0.05
    wfc = jax.random.normal(k5, (OUT, CO2 * (L // 2)), dtype=jnp.float32) * 0.02
    bfc = jax.random.normal(k6, (OUT,), dtype=jnp.float32) * 0.02

    params = prepare_params(w1, b1, w2, b2, wfc, bfc, input_size=L)

    fwd = jax.jit(convnet_forward)
    out = jax.block_until_ready(fwd(x, params))

    ref = ref_forward(x, w1, b1, w2, b2, wfc, bfc)
    np.testing.assert_allclose(np.asarray(out), np.asarray(ref),
                               rtol=2e-3, atol=2e-3)

    print("KERNEL_OK")
</pallas_src>

<mosaic_0001>
module attributes {stable_mosaic.version = 11 : i64} {
  func.func @kernel(%arg0: memref<32x4xf32, #tpu.memory_space<vmem>>, %arg1: memref<3x4x64xf32, #tpu.memory_space<vmem>>, %arg2: memref<1x64xf32, #tpu.memory_space<vmem>>, %arg3: memref<3x64x128xf32, #tpu.memory_space<vmem>>, %arg4: memref<1x128xf32, #tpu.memory_space<vmem>>, %arg5: memref<8x32x128xf32, #tpu.memory_space<vmem>>, %arg6: memref<1x8xf32, #tpu.memory_space<vmem>>, %arg7: memref<1x8xf32, #tpu.memory_space<vmem>>) attributes {dimension_semantics = [], scalar_prefetch = 0 : i64, scratch_operands = 0 : i64, tpu.core_type = #tpu.core_type<tc>} {
    %c0 = arith.constant 0 : index
    %c0_0 = arith.constant 0 : index
    %0 = vector.load %arg0[%c0, %c0_0] : memref<32x4xf32, #tpu.memory_space<vmem>>, vector<32x4xf32>
    %1 = tpu.iota {dimensions = array<i32: 0>} : vector<32x1xi32>
    %c16_i32 = arith.constant 16 : i32
    %c0_i32 = arith.constant 0 : i32
    %2 = arith.cmpi eq, %c16_i32, %c0_i32 : i32
    %c1_i32 = arith.constant 1 : i32
    %3 = arith.select %2, %c1_i32, %c16_i32 : i32
    %4 = vector.broadcast %3 : i32 to vector<32x1xi32>
    %5 = arith.remsi %1, %4 : vector<32x1xi32>
    %c0_i32_1 = arith.constant 0 : i32
    %6 = vector.broadcast %c0_i32_1 : i32 to vector<32x1xi32>
    %7 = arith.cmpi ne, %5, %6 : vector<32x1xi32>
    %c0_i32_2 = arith.constant 0 : i32
    %8 = vector.broadcast %c0_i32_2 : i32 to vector<32x1xi32>
    %9 = arith.cmpi slt, %5, %8 : vector<32x1xi32>
    %c0_i32_3 = arith.constant 0 : i32
    %10 = arith.cmpi slt, %3, %c0_i32_3 : i32
    %11 = vector.broadcast %10 : i1 to vector<32x1xi1>
    %12 = vector.broadcast %11 : vector<32x1xi1> to vector<32x1xi1>
    %13 = arith.xori %9, %12 : vector<32x1xi1>
    %14 = arith.andi %13, %7 : vector<32x1xi1>
    %15 = vector.broadcast %3 : i32 to vector<32x1xi32>
    %16 = arith.addi %5, %15 : vector<32x1xi32>
    %17 = arith.select %14, %16, %5 : vector<32x1xi1>, vector<32x1xi32>
    %c0_i32_4 = arith.constant 0 : i32
    %18 = vector.broadcast %c0_i32_4 : i32 to vector<32x1xi32>
    %19 = arith.cmpi ne, %17, %18 : vector<32x1xi32>
    %c15_i32 = arith.constant 15 : i32
    %20 = vector.broadcast %c15_i32 : i32 to vector<32x1xi32>
    %21 = arith.cmpi ne, %17, %20 : vector<32x1xi32>
    %c2_i32 = arith.constant 2 : i32
    %c0_i32_5 = arith.constant 0 : i32
    %22 = arith.cmpi eq, %c2_i32, %c0_i32_5 : i32
    %c1_i32_6 = arith.constant 1 : i32
    %23 = arith.select %22, %c1_i32_6, %c2_i32 : i32
    %24 = vector.broadcast %23 : i32 to vector<32x1xi32>
    %25 = arith.remsi %17, %24 : vector<32x1xi32>
    %c0_i32_7 = arith.constant 0 : i32
    %26 = vector.broadcast %c0_i32_7 : i32 to vector<32x1xi32>
    %27 = arith.cmpi ne, %25, %26 : vector<32x1xi32>
    %c0_i32_8 = arith.constant 0 : i32
    %28 = vector.broadcast %c0_i32_8 : i32 to vector<32x1xi32>
    %29 = arith.cmpi slt, %25, %28 : vector<32x1xi32>
    %c0_i32_9 = arith.constant 0 : i32
    %30 = arith.cmpi slt, %23, %c0_i32_9 : i32
    %31 = vector.broadcast %30 : i1 to vector<32x1xi1>
    %32 = vector.broadcast %31 : vector<32x1xi1> to vector<32x1xi1>
    %33 = arith.xori %29, %32 : vector<32x1xi1>
    %34 = arith.andi %33, %27 : vector<32x1xi1>
    %35 = vector.broadcast %23 : i32 to vector<32x1xi32>
    %36 = arith.addi %25, %35 : vector<32x1xi32>
    %37 = arith.select %34, %36, %25 : vector<32x1xi1>, vector<32x1xi32>
    %c0_i32_10 = arith.constant 0 : i32
    %38 = vector.broadcast %c0_i32_10 : i32 to vector<32x1xi32>
    %39 = arith.cmpi eq, %37, %38 : vector<32x1xi32>
    %c2_i32_11 = arith.constant 2 : i32
    %40 = vector.broadcast %c2_i32_11 : i32 to vector<32x1xi32>
    %41 = arith.cmpi sge, %17, %40 : vector<32x1xi32>
    %c14_i32 = arith.constant 14 : i32
    %42 = vector.broadcast %c14_i32 : i32 to vector<32x1xi32>
    %43 = arith.cmpi slt, %17, %42 : vector<32x1xi32>
    %c1_i32_12 = arith.constant 1 : i32
    %44 = tpu.dynamic_rotate %0 by %c1_i32_12 dim 0 : vector<32x4xf32>, i32 -> vector<32x4xf32>
    %cst = arith.constant 0.000000e+00 : f32
    %45 = vector.shape_cast %19 : vector<32x1xi1> to vector<32x1xi1>
    %46 = vector.broadcast %45 : vector<32x1xi1> to vector<32x4xi1>
    %47 = vector.broadcast %cst : f32 to vector<32x4xf32>
    %48 = arith.select %46, %44, %47 : vector<32x4xi1>, vector<32x4xf32>
    %c31_i32 = arith.constant 31 : i32
    %49 = tpu.dynamic_rotate %0 by %c31_i32 dim 0 : vector<32x4xf32>, i32 -> vector<32x4xf32>
    %cst_13 = arith.constant 0.000000e+00 : f32
    %50 = vector.shape_cast %21 : vector<32x1xi1> to vector<32x1xi1>
    %51 = vector.broadcast %50 : vector<32x1xi1> to vector<32x4xi1>
    %52 = vector.broadcast %cst_13 : f32 to vector<32x4xf32>
    %53 = arith.select %51, %49, %52 : vector<32x4xi1>, vector<32x4xf32>
    %c0_14 = arith.constant 0 : index
    %c0_15 = arith.constant 0 : index
    %c0_16 = arith.constant 0 : index
    %54 = vector.load %arg1[%c0_14, %c0_15, %c0_16] : memref<3x4x64xf32, #tpu.memory_space<vmem>>, vector<1x4x64xf32>
    %55 = vector.shape_cast %54 : vector<1x4x64xf32> to vector<4x64xf32>
    %cst_17 = arith.constant dense<0.000000e+00> : vector<32x64xf32>
    %56 = tpu.matmul %48, %55, %cst_17 {dimension_numbers = #tpu.dot_dimension_numbers<[1], [0], [0], [1], [0, 0, 1, 1], [], []>} : vector<32x4xf32>, vector<4x64xf32>, vector<32x64xf32> -> vector<32x64xf32>
    %c1 = arith.constant 1 : index
    %c0_18 = arith.constant 0 : index
    %c0_19 = arith.constant 0 : index
    %57 = vector.load %arg1[%c1, %c0_18, %c0_19] : memref<3x4x64xf32, #tpu.memory_space<vmem>>, vector<1x4x64xf32>
    %58 = vector.shape_cast %57 : vector<1x4x64xf32> to vector<4x64xf32>
    %cst_20 = arith.constant dense<0.000000e+00> : vector<32x64xf32>
    %59 = tpu.matmul %0, %58, %cst_20 {dimension_numbers = #tpu.dot_dimension_numbers<[1], [0], [0], [1], [0, 0, 1, 1], [], []>} : vector<32x4xf32>, vector<4x64xf32>, vector<32x64xf32> -> vector<32x64xf32>
    %60 = arith.addf %56, %59 : vector<32x64xf32>
    %c2 = arith.constant 2 : index
    %c0_21 = arith.constant 0 : index
    %c0_22 = arith.constant 0 : index
    %61 = vector.load %arg1[%c2, %c0_21, %c0_22] : memref<3x4x64xf32, #tpu.memory_space<vmem>>, vector<1x4x64xf32>
    %62 = vector.shape_cast %61 : vector<1x4x64xf32> to vector<4x64xf32>
    %cst_23 = arith.constant dense<0.000000e+00> : vector<32x64xf32>
    %63 = tpu.matmul %53, %62, %cst_23 {dimension_numbers = #tpu.dot_dimension_numbers<[1], [0], [0], [1], [0, 0, 1, 1], [], []>} : vector<32x4xf32>, vector<4x64xf32>, vector<32x64xf32> -> vector<32x64xf32>
    %64 = arith.addf %60, %63 : vector<32x64xf32>
    %c0_24 = arith.constant 0 : index
    %c0_25 = arith.constant 0 : index
    %65 = vector.load %arg2[%c0_24, %c0_25] : memref<1x64xf32, #tpu.memory_space<vmem>>, vector<1x64xf32>
    %66 = vector.broadcast %65 : vector<1x64xf32> to vector<32x64xf32>
    %67 = arith.addf %64, %66 : vector<32x64xf32>
    %cst_26 = arith.constant 0.000000e+00 : f32
    %68 = vector.broadcast %cst_26 : f32 to vector<32x64xf32>
    %69 = arith.maximumf %67, %68 : vector<32x64xf32>
    %c31_i32_27 = arith.constant 31 : i32
    %70 = tpu.dynamic_rotate %69 by %c31_i32_27 dim 0 : vector<32x64xf32>, i32 -> vector<32x64xf32>
    %71 = arith.maximumf %69, %70 : vector<32x64xf32>
    %c1_i32_28 = arith.constant 1 : i32
    %72 = tpu.dynamic_rotate %69 by %c1_i32_28 dim 0 : vector<32x64xf32>, i32 -> vector<32x64xf32>
    %73 = arith.maximumf %69, %72 : vector<32x64xf32>
    %74 = vector.shape_cast %39 : vector<32x1xi1> to vector<32x1xi1>
    %75 = vector.broadcast %74 : vector<32x1xi1> to vector<32x64xi1>
    %76 = arith.select %75, %71, %73 : vector<32x64xi1>, vector<32x64xf32>
    %c2_i32_29 = arith.constant 2 : i32
    %77 = tpu.dynamic_rotate %76 by %c2_i32_29 dim 0 : vector<32x64xf32>, i32 -> vector<32x64xf32>
    %cst_30 = arith.constant 0.000000e+00 : f32
    %78 = vector.shape_cast %41 : vector<32x1xi1> to vector<32x1xi1>
    %79 = vector.broadcast %78 : vector<32x1xi1> to vector<32x64xi1>
    %80 = vector.broadcast %cst_30 : f32 to vector<32x64xf32>
    %81 = arith.select %79, %77, %80 : vector<32x64xi1>, vector<32x64xf32>
    %c30_i32 = arith.constant 30 : i32
    %82 = tpu.dynamic_rotate %76 by %c30_i32 dim 0 : vector<32x64xf32>, i32 -> vector<32x64xf32>
    %cst_31 = arith.constant 0.000000e+00 : f32
    %83 = vector.shape_cast %43 : vector<32x1xi1> to vector<32x1xi1>
    %84 = vector.broadcast %83 : vector<32x1xi1> to vector<32x64xi1>
    %85 = vector.broadcast %cst_31 : f32 to vector<32x64xf32>
    %86 = arith.select %84, %82, %85 : vector<32x64xi1>, vector<32x64xf32>
    %c0_32 = arith.constant 0 : index
    %c0_33 = arith.constant 0 : index
    %c0_34 = arith.constant 0 : index
    %87 = vector.load %arg3[%c0_32, %c0_33, %c0_34] : memref<3x64x128xf32, #tpu.memory_space<vmem>>, vector<1x64x128xf32>
    %88 = vector.shape_cast %87 : vector<1x64x128xf32> to vector<64x128xf32>
    %cst_35 = arith.constant dense<0.000000e+00> : vector<32x128xf32>
    %89 = tpu.matmul %81, %88, %cst_35 {dimension_numbers = #tpu.dot_dimension_numbers<[1], [0], [0], [1], [0, 0, 1, 1], [], []>} : vector<32x64xf32>, vector<64x128xf32>, vector<32x128xf32> -> vector<32x128xf32>
    %c1_36 = arith.constant 1 : index
    %c0_37 = arith.constant 0 : index
    %c0_38 = arith.constant 0 : index
    %90 = vector.load %arg3[%c1_36, %c0_37, %c0_38] : memref<3x64x128xf32, #tpu.memory_space<vmem>>, vector<1x64x128xf32>
    %91 = vector.shape_cast %90 : vector<1x64x128xf32> to vector<64x128xf32>
    %cst_39 = arith.constant dense<0.000000e+00> : vector<32x128xf32>
    %92 = tpu.matmul %76, %91, %cst_39 {dimension_numbers = #tpu.dot_dimension_numbers<[1], [0], [0], [1], [0, 0, 1, 1], [], []>} : vector<32x64xf32>, vector<64x128xf32>, vector<32x128xf32> -> vector<32x128xf32>
    %93 = arith.addf %89, %92 : vector<32x128xf32>
    %c2_40 = arith.constant 2 : index
    %c0_41 = arith.constant 0 : index
    %c0_42 = arith.constant 0 : index
    %94 = vector.load %arg3[%c2_40, %c0_41, %c0_42] : memref<3x64x128xf32, #tpu.memory_space<vmem>>, vector<1x64x128xf32>
    %95 = vector.shape_cast %94 : vector<1x64x128xf32> to vector<64x128xf32>
    %cst_43 = arith.constant dense<0.000000e+00> : vector<32x128xf32>
    %96 = tpu.matmul %86, %95, %cst_43 {dimension_numbers = #tpu.dot_dimension_numbers<[1], [0], [0], [1], [0, 0, 1, 1], [], []>} : vector<32x64xf32>, vector<64x128xf32>, vector<32x128xf32> -> vector<32x128xf32>
    %97 = arith.addf %93, %96 : vector<32x128xf32>
    %c0_44 = arith.constant 0 : index
    %c0_45 = arith.constant 0 : index
    %98 = vector.load %arg4[%c0_44, %c0_45] : memref<1x128xf32, #tpu.memory_space<vmem>>, vector<1x128xf32>
    %99 = vector.broadcast %98 : vector<1x128xf32> to vector<32x128xf32>
    %100 = arith.addf %97, %99 : vector<32x128xf32>
    %cst_46 = arith.constant 0.000000e+00 : f32
    %101 = vector.broadcast %cst_46 : f32 to vector<32x128xf32>
    %102 = arith.maximumf %100, %101 : vector<32x128xf32>
    %c30_i32_47 = arith.constant 30 : i32
    %103 = tpu.dynamic_rotate %102 by %c30_i32_47 dim 0 : vector<32x128xf32>, i32 -> vector<32x128xf32>
    %104 = arith.maximumf %102, %103 : vector<32x128xf32>
    %c0_48 = arith.constant 0 : index
    %c0_49 = arith.constant 0 : index
    %c0_50 = arith.constant 0 : index
    %105 = vector.load %arg5[%c0_48, %c0_49, %c0_50] : memref<8x32x128xf32, #tpu.memory_space<vmem>>, vector<1x32x128xf32>
    %106 = vector.shape_cast %105 : vector<1x32x128xf32> to vector<32x128xf32>
    %107 = arith.mulf %104, %106 : vector<32x128xf32>
    %cst_51 = arith.constant dense<0.000000e+00> : vector<32xf32>
    %108 = vector.multi_reduction <add>, %107, %cst_51 [1] : vector<32x128xf32> to vector<32xf32>
    %109 = vector.shape_cast %108 : vector<32xf32> to vector<32x1xf32>
    %c1_52 = arith.constant 1 : index
    %c0_53 = arith.constant 0 : index
    %c0_54 = arith.constant 0 : index
    %110 = vector.load %arg5[%c1_52, %c0_53, %c0_54] : memref<8x32x128xf32, #tpu.memory_space<vmem>>, vector<1x32x128xf32>
    %111 = vector.shape_cast %110 : vector<1x32x128xf32> to vector<32x128xf32>
    %112 = arith.mulf %104, %111 : vector<32x128xf32>
    %cst_55 = arith.constant dense<0.000000e+00> : vector<32xf32>
    %113 = vector.multi_reduction <add>, %112, %cst_55 [1] : vector<32x128xf32> to vector<32xf32>
    %114 = vector.shape_cast %113 : vector<32xf32> to vector<32x1xf32>
    %c2_56 = arith.constant 2 : index
    %c0_57 = arith.constant 0 : index
    %c0_58 = arith.constant 0 : index
    %115 = vector.load %arg5[%c2_56, %c0_57, %c0_58] : memref<8x32x128xf32, #tpu.memory_space<vmem>>, vector<1x32x128xf32>
    %116 = vector.shape_cast %115 : vector<1x32x128xf32> to vector<32x128xf32>
    %117 = arith.mulf %104, %116 : vector<32x128xf32>
    %cst_59 = arith.constant dense<0.000000e+00> : vector<32xf32>
    %118 = vector.multi_reduction <add>, %117, %cst_59 [1] : vector<32x128xf32> to vector<32xf32>
    %119 = vector.shape_cast %118 : vector<32xf32> to vector<32x1xf32>
    %c3 = arith.constant 3 : index
    %c0_60 = arith.constant 0 : index
    %c0_61 = arith.constant 0 : index
    %120 = vector.load %arg5[%c3, %c0_60, %c0_61] : memref<8x32x128xf32, #tpu.memory_space<vmem>>, vector<1x32x128xf32>
    %121 = vector.shape_cast %120 : vector<1x32x128xf32> to vector<32x128xf32>
    %122 = arith.mulf %104, %121 : vector<32x128xf32>
    %cst_62 = arith.constant dense<0.000000e+00> : vector<32xf32>
    %123 = vector.multi_reduction <add>, %122, %cst_62 [1] : vector<32x128xf32> to vector<32xf32>
    %124 = vector.shape_cast %123 : vector<32xf32> to vector<32x1xf32>
    %c4 = arith.constant 4 : index
    %c0_63 = arith.constant 0 : index
    %c0_64 = arith.constant 0 : index
    %125 = vector.load %arg5[%c4, %c0_63, %c0_64] : memref<8x32x128xf32, #tpu.memory_space<vmem>>, vector<1x32x128xf32>
    %126 = vector.shape_cast %125 : vector<1x32x128xf32> to vector<32x128xf32>
    %127 = arith.mulf %104, %126 : vector<32x128xf32>
    %cst_65 = arith.constant dense<0.000000e+00> : vector<32xf32>
    %128 = vector.multi_reduction <add>, %127, %cst_65 [1] : vector<32x128xf32> to vector<32xf32>
    %129 = vector.shape_cast %128 : vector<32xf32> to vector<32x1xf32>
    %c5 = arith.constant 5 : index
    %c0_66 = arith.constant 0 : index
    %c0_67 = arith.constant 0 : index
    %130 = vector.load %arg5[%c5, %c0_66, %c0_67] : memref<8x32x128xf32, #tpu.memory_space<vmem>>, vector<1x32x128xf32>
    %131 = vector.shape_cast %130 : vector<1x32x128xf32> to vector<32x128xf32>
    %132 = arith.mulf %104, %131 : vector<32x128xf32>
    %cst_68 = arith.constant dense<0.000000e+00> : vector<32xf32>
    %133 = vector.multi_reduction <add>, %132, %cst_68 [1] : vector<32x128xf32> to vector<32xf32>
    %134 = vector.shape_cast %133 : vector<32xf32> to vector<32x1xf32>
    %c6 = arith.constant 6 : index
    %c0_69 = arith.constant 0 : index
    %c0_70 = arith.constant 0 : index
    %135 = vector.load %arg5[%c6, %c0_69, %c0_70] : memref<8x32x128xf32, #tpu.memory_space<vmem>>, vector<1x32x128xf32>
    %136 = vector.shape_cast %135 : vector<1x32x128xf32> to vector<32x128xf32>
    %137 = arith.mulf %104, %136 : vector<32x128xf32>
    %cst_71 = arith.constant dense<0.000000e+00> : vector<32xf32>
    %138 = vector.multi_reduction <add>, %137, %cst_71 [1] : vector<32x128xf32> to vector<32xf32>
    %139 = vector.shape_cast %138 : vector<32xf32> to vector<32x1xf32>
    %c7 = arith.constant 7 : index
    %c0_72 = arith.constant 0 : index
    %c0_73 = arith.constant 0 : index
    %140 = vector.load %arg5[%c7, %c0_72, %c0_73] : memref<8x32x128xf32, #tpu.memory_space<vmem>>, vector<1x32x128xf32>
    %141 = vector.shape_cast %140 : vector<1x32x128xf32> to vector<32x128xf32>
    %142 = arith.mulf %104, %141 : vector<32x128xf32>
    %cst_74 = arith.constant dense<0.000000e+00> : vector<32xf32>
    %143 = vector.multi_reduction <add>, %142, %cst_74 [1] : vector<32x128xf32> to vector<32xf32>
    %144 = vector.shape_cast %143 : vector<32xf32> to vector<32x1xf32>
    %145 = tpu.concatenate %109, %114, %119, %124, %129, %134, %139, %144 in 1 : vector<32x1xf32>, vector<32x1xf32>, vector<32x1xf32>, vector<32x1xf32>, vector<32x1xf32>, vector<32x1xf32>, vector<32x1xf32>, vector<32x1xf32> -> vector<32x8xf32>
    %cst_75 = arith.constant dense<0.000000e+00> : vector<8xf32>
    %146 = vector.multi_reduction <add>, %145, %cst_75 [0] : vector<32x8xf32> to vector<8xf32>
    %147 = vector.shape_cast %146 : vector<8xf32> to vector<1x8xf32>
    %c0_76 = arith.constant 0 : index
    %c0_77 = arith.constant 0 : index
    %148 = vector.load %arg6[%c0_76, %c0_77] : memref<1x8xf32, #tpu.memory_space<vmem>>, vector<1x8xf32>
    %149 = arith.addf %147, %148 : vector<1x8xf32>
    %c0_78 = arith.constant 0 : index
    %c0_79 = arith.constant 0 : index
    %150 = vector.load %arg7[%c0_78, %c0_79] : memref<1x8xf32, #tpu.memory_space<vmem>>, vector<1x8xf32>
    tpu.vector_store %arg7[%c0_78, %c0_79], %149 {strides = array<i32>} : memref<1x8xf32, #tpu.memory_space<vmem>>, vector<1x8xf32>,
    return
  }
}

</mosaic_0001>

<bundles_post_ra>
// kernel: convnet_forward.1
= control target key start
LH: loop header
LB: loop body
LE: loop exit
PB: predicated region body
PF: predicated region fallthrough
CT: control target
= control target key end

     0   :  { %12 = vsyncpa [#allocation3], 0  ;;  %s1808_s0 = inlined_call_operand.vmem [shape: f32[32,4], index: 0, kind: input, shape index: {}]   ;;  %s1809_s1 = inlined_call_operand.vmem [shape: f32[3,4,64], index: 1, kind: input, shape index: {}]   ;;  %s1810_s2 = inlined_call_operand.vmem [shape: f32[1,64], index: 2, kind: input, shape index: {}]   ;;  %s1811_s3 = inlined_call_operand.hbm [shape: f32[3,64,128], index: 3, kind: input, shape index: {}]   ;;  %s1812_s4 = inlined_call_operand.vmem [shape: f32[1,128], index: 4, kind: input, shape index: {}]   ;;  %s1813_s5 = inlined_call_operand.hbm [shape: f32[8,32,128], index: 5, kind: input, shape index: {}]   ;;  %s1814_s6 = inlined_call_operand.vmem [shape: f32[1,8], index: 6, kind: input, shape index: {}]   ;;  %s1815_s7 = inlined_call_operand.hbm [shape: f32[1,8], index: 7, kind: output, shape index: {}]  }
   0x1   :  { %13 = vsyncpa [#allocation6], 0 }
   0x2   :  { %14 = vsyncpa [#allocation4], 0  ;;  %s1491_s24 = smov [#allocation2]   ;;  %s1419_s28 = scalar_lea.hbm %s1811_s3, 3072 }
   0x3   :  { %s26_s25 = sshll.u32 %s1491_s24, 4  ;;  %p1420_p0 = scmp.ne.s32.totalorder %s1811_s3, %s1419_s28  ;;  %s27_s25 = int_to_ptr.vmem [resolvable:$true] %s26_s25 }
   0x4   :  { %p1423_p1 = scmp.lt.u32.totalorder %s1419_s28, %s1811_s3 }
   0x6   :  { %p1425_p2 = pnand %p1423_p1, %p1420_p0 }
   0x8   :  { %1428 = shalt.err (!%p1425_p2)
}
   0x9   :  { %s1429_s10 = scalar_lea.vmem %s27_s25, 3072  ;;  %p1434_p4 = scmp.lt.s32.totalorder %s27_s25, %s27_s25 }
   0xa   :  { %p1430_p3 = scmp.ne.s32.totalorder %s27_s25, %s1429_s10  ;;  %p1435_p5 = scmp.lt.s32.totalorder %s1429_s10, %s1429_s10 }
   0xc   :  { %p1436_p6 = por %p1435_p5, %p1434_p4 }
   0xe   :  { %p1437_p7 = pnand %p1436_p6, %p1430_p3 }
  0x10   :  { %1440 = shalt.err (!%p1437_p7)
}
  0x11   :  { %s1492_s11 = smov 128   ;;  %s1493_s12 = smov 8  }
  0x12   :  { %32 = dma.hbm_to_vmem [thread:$0]  %s1811_s3, 3072, %s27_s25, [#allocation3], %s1492_s11, %s1492_s11, %s1493_s12  }
  0x13   :  { %s1494_s15 = smov [#allocation5]   ;;  %s1441_s19 = scalar_lea.hbm %s1813_s5, 4096 }
  0x14   :  { %s40_s16 = sshll.u32 %s1494_s15, 4  ;;  %p1442_p8 = scmp.ne.s32.totalorder %s1813_s5, %s1441_s19  ;;  %s41_s16 = int_to_ptr.vmem [resolvable:$true] %s40_s16 }
  0x15   :  { %p1445_p9 = scmp.lt.u32.totalorder %s1441_s19, %s1813_s5 }
  0x17   :  { %p1447_p10 = pnand %p1445_p9, %p1442_p8 }
  0x19   :  { %1450 = shalt.err (!%p1447_p10)
}
  0x1a   :  { %s1451_s24 = scalar_lea.vmem %s41_s16, 4096  ;;  %p1456_p12 = scmp.lt.s32.totalorder %s41_s16, %s41_s16 }
  0x1b   :  { %p1452_p11 = scmp.ne.s32.totalorder %s41_s16, %s1451_s24  ;;  %p1457_p13 = scmp.lt.s32.totalorder %s1451_s24, %s1451_s24 }
  0x1d   :  { %p1458_p0 = por %p1457_p13, %p1456_p12 }
  0x1f   :  { %p1459_p1 = pnand %p1458_p0, %p1452_p11 }
  0x21   :  { %1462 = shalt.err (!%p1459_p1)
}
  0x22   :  { %46 = dma.hbm_to_vmem [thread:$0]  %s1813_s5, 4096, %s41_s16, [#allocation6], %s1492_s11, %s1492_s11, %s1493_s12  }
  0x23   :  { %1485 = dma.done.wait [#allocation3], 3072  }
  0x24   :  { %1486 = vsyncadd [#allocation3], 4294964224 }
  0x25   :  { %1487 = dma.done.wait [#allocation6], 4096  }
  0x26   :  { %1488 = vsyncadd [#allocation6], 4294963200  ;;  %v59_v0 = vlaneseq  ;;  %vm238_vm0 = vcmask 1043456   ;;  %vm225_vm1 = vcmask 31744   ;;  %v1178_v4 = vld [vmem:[%s1809_s1 + $0x4] sm:$0xf] }
  0x27   :  { %v55_v5 = vld [vmem:[%s1808_s0] sm:$0xff]  ;;  %v56_v6 = vld [vmem:[%s1808_s0 + $0x8] sm:$0xff]  ;;  %1260 = vmatprep.subr.msk.mxu0 %vm238_vm0, %v1178_v4  ;;  %v57_v9 = vld [vmem:[%s1808_s0 + $0x10] sm:$0xff]  ;;  %vm643_vm9 = vcmask 523264   ;;  %s1495_s18 = smov [#allocation7]  }
  0x28   :  { %v1560_v1 = vshrl.u32 %v59_v0, 7  ;;  %v180_v7 = vrot.slane %v55_v5, 7  ;;  %1262 = vmatprep.mubr.msk.f32.mxu0 %vm225_vm1, %v55_v5  ;;  %v222_v8 = vld [vmem:[%s1809_s1] sm:$0xf]  ;;  %1261 = vmatpush3.msk.msra.mxu0 %vm238_vm0, %v1178_v4  ;;  %v58_v10 = vld [vmem:[%s1808_s0 + $0x18] sm:$0xff]  ;;  %v182_v13 = vrot.slane %v57_v9, 7 }
  0x29   :  { %v1189_v11 = vld [vmem:[%s1809_s1 + $0x8] sm:$0xf]  ;;  %1263 = vmatmul.mubr.msk.f32.vlgmr.msra.gmra.mrb[0].mxu0 %vm225_vm1, %v56_v6  ;;  %1268 = vmatprep.subr.msk.mxu0 %vm238_vm0, %v222_v8  ;;  %v183_v14 = vrot.slane %v58_v10, 7  ;;  %v181_v15 = vrot.slane %v56_v6, 7  ;;  %v201_v23 = vrot.slane %v55_v5, 1  ;;  %v202_v24 = vrot.slane %v56_v6, 1 }
  0x2a   :  { %v62_v2 = vadd.s32 16, %v1560_v1  ;;  %v1564_v3 = vand.u32 15, %v1560_v1  ;;  %vm184_vm2 = vcmp.lt.s32.totalorder %v1560_v1, 1  ;;  %1269 = vmatpush3.msk.msra.mxu0 %vm238_vm0, %v222_v8  ;;  %1265 = vmatprep.mubr.msk.f32.mxu0 %vm225_vm1, %v57_v9  ;;  %v61_v16 = vadd.s32 8, %v1560_v1  ;;  %v635_v36 = vld [vmem:[#allocation2 + $0x40] sm:$0xff]  ;;  %v636_v37 = vld [vmem:[#allocation2 + $0x48] sm:$0xff] }
  0x2b   :  { %v188_v17 = vsel %vm184_vm2, %v183_v14, %v180_v7  ;;  %1276 = vmatprep.subr.msk.mxu0 %vm238_vm0, %v1189_v11  ;;  %v186_v19 = vsel %vm184_vm2, %v181_v15, %v182_v13  ;;  %v187_v20 = vsel %vm184_vm2, %v180_v7, %v181_v15  ;;  %v63_v22 = vadd.s32 24, %v1560_v1  ;;  %v637_v39 = vld [vmem:[#allocation2 + $0x50] sm:$0xff]  ;;  %v638_v40 = vld [vmem:[#allocation2 + $0x58] sm:$0xff]  ;;  %v626_v41 = vld [vmem:[#allocation2] sm:$0xff]  ;;  %s1168_s19 = sshll.u32 %s1495_s18, 4  ;;  %s1169_s19 = int_to_ptr.vmem [resolvable:$true] %s1168_s19 }
  0x2c   :  { %v1591_v12 = vand.u32 15, %v62_v2  ;;  %vm112_vm3 = vcmp.ne.s32.totalorder %v1564_v3, 0  ;;  %v1609_v21 = vand.u32 15, %v61_v16  ;;  %v203_v25 = vrot.slane %v57_v9, 1  ;;  %v627_v43 = vld [vmem:[#allocation2 + $0x8] sm:$0xff]  ;;  %v639_v45 = vld [vmem:[#allocation2 + $0x60] sm:$0xff]  ;;  %p1468_p3 = scmp.lt.s32.totalorder %s1169_s19, %s1169_s19 }
  0x2d   :  { %v197_v18 = vsel %vm112_vm3, %v188_v17, 0.0  ;;  %1266 = vmatmul.mubr.msk.f32.gmra.mrb[2].mxu0 %vm225_vm1, %v58_v10  ;;  %vm205_vm5 = vcmp.lt.s32.totalorder %v1560_v1, 7  ;;  %v185_v27 = vsel %vm184_vm2, %v182_v13, %v183_v14  ;;  %v1618_v28 = vand.u32 15, %v63_v22  ;;  %v640_v46 = vld [vmem:[#allocation2 + $0x68] sm:$0xff]  ;;  %v628_v47 = vld [vmem:[#allocation2 + $0x10] sm:$0xff]  ;;  %v629_v49 = vld [vmem:[#allocation2 + $0x18] sm:$0xff] }
  0x2e   :  { %vm114_vm4 = vcmp.ne.s32.totalorder %v1591_v12, 0  ;;  %1270 = vmatprep.mubr.msk.f32.mxu0 %vm225_vm1, %v197_v18  ;;  %v204_v29 = vrot.slane %v58_v10, 1  ;;  %v208_v30 = vsel %vm205_vm5, %v201_v23, %v202_v24  ;;  %vm117_vm6 = vcmp.ne.s32.totalorder %v1609_v21, 15  ;;  %v641_v51 = vld [vmem:[#allocation2 + $0x70] sm:$0xff]  ;;  %v642_v52 = vld [vmem:[#allocation2 + $0x78] sm:$0xff]  ;;  %v630_v53 = vld [vmem:[#allocation2 + $0x20] sm:$0xff] }
  0x2f   :  { %v199_v26 = vsel %vm114_vm4, %v186_v19, 0.0  ;;  %v207_v31 = vsel %vm205_vm5, %v202_v24, %v203_v25  ;;  %vm119_vm7 = vcmp.ne.s32.totalorder %v1618_v28, 15  ;;  %v1350_v38 = vpack.c.bf16 %v636_v37, %v635_v36  ;;  %v631_v55 = vld [vmem:[#allocation2 + $0x28] sm:$0xff]  ;;  %v632_v57 = vld [vmem:[#allocation2 + $0x30] sm:$0xff]  ;;  %v633_v58 = vld [vmem:[#allocation2 + $0x38] sm:$0xff]  ;;  %s1463_s20 = scalar_lea.vmem %s1169_s19, 16 }
  0x30   :  { %v219_v32 = vsel %vm117_vm6, %v207_v31, 0.0  ;;  %v206_v33 = vsel %vm205_vm5, %v203_v25, %v204_v29  ;;  %v209_v34 = vsel %vm205_vm5, %v204_v29, %v201_v23  ;;  %v1354_v42 = vpack.c.bf16 %v638_v40, %v637_v39  ;;  %v839_v60 = vld [vmem:[#allocation2 + $0x80] sm:$0xff]  ;;  %v840_v61 = vld [vmem:[#allocation2 + $0x88] sm:$0xff]  ;;  %p1464_p2 = scmp.ne.s32.totalorder %s1169_s19, %s1463_s20  ;;  %s1467_s21 = scalar_lea.vmem %s1169_s19, 32 }
  0x31   :  { %1271 = vmatmul.mubr.msk.f32.vlgmr.msra.gmra.mrb[0].mxu0 %vm225_vm1, %v187_v20  ;;  %v221_v35 = vsel %vm119_vm7, %v209_v34, 0.0  ;;  %v1366_v44 = vpack.c.bf16 %v627_v43, %v626_v41  ;;  %v1358_v48 = vpack.c.bf16 %v640_v46, %v639_v45  ;;  %v1370_v50 = vpack.c.bf16 %v629_v49, %v628_v47  ;;  %v1195_v63 = vld [vmem:[%s1810_s2] ss:$0 sm:$0xff]  ;;  %p1469_p4 = scmp.lt.s32.totalorder %s1467_s21, %s1463_s20 }
  0x32   :  { %1277 = vmatpush3.msk.msra.mxu0 %vm238_vm0, %v1189_v11  ;;  %1273 = vmatprep.mubr.msk.f32.mxu0 %vm225_vm1, %v199_v26  ;;  %v1362_v54 = vpack.c.bf16 %v642_v52, %v641_v51  ;;  %v1374_v56 = vpack.c.bf16 %v631_v55, %v630_v53  ;;  %v1378_v59 = vpack.c.bf16 %v633_v58, %v632_v57  ;;  %v124_v9 = vand.u32 1, %v1564_v3 }
  0x33   :  { %1351 = vmatprep.subr.bf16.mxu0 %v1350_v38  ;;  %1367 = vmatprep.subr.bf16.mxu1 %v1366_v44  ;;  %v1635_v62 = vpack.c.bf16 %v840_v61, %v839_v60  ;;  %v131_v18 = vand.u32 1, %v1609_v21  ;;  %v138_v20 = vand.u32 1, %v1591_v12  ;;  %v145_v22 = vand.u32 1, %v1618_v28  ;;  %p1470_p5 = por %p1469_p4, %p1468_p3 }
  0x34   :  { %1369 = vmatpush3.bf16.msra.mxu1 %v1366_v44  ;;  %vm1647_vm8 = vcmp.eq.s32.totalorder %v124_v9, 0  ;;  %vm588_vm13 = vcmp.lt.s32.totalorder %v1560_v1, 2  ;;  %vm609_vm14 = vcmp.lt.s32.totalorder %v1560_v1, 6  ;;  %vm172_vm15 = vcmp.ge.s32.totalorder %v1564_v3, 2  ;;  %v993_v1 = vld [vmem:[#allocation5 + $0x28] sm:$0xff] }
  0x35   :  { %1274 = vmatmul.mubr.msk.f32.gmra.mrb[2].mxu0 %vm225_vm1, %v185_v27  ;;  %1371 = vmatprep.subr.bf16.mxu1 %v1370_v50  ;;  %vm1653_vm10 = vcmp.eq.s32.totalorder %v131_v18, 0  ;;  %vm1659_vm11 = vcmp.eq.s32.totalorder %v138_v20, 0  ;;  %vm1663_vm12 = vcmp.eq.s32.totalorder %v145_v22, 0  ;;  %vm174_vm0 = vcmp.ge.s32.totalorder %v1591_v12, 2  ;;  %p1471_p6 = pnand %p1470_p5, %p1464_p2 }
  0x36   :  { %1278 = vmatprep.mubr.msk.f32.mxu0 %vm225_vm1, %v208_v30  ;;  %vm179_vm3 = vcmp.lt.s32.totalorder %v1618_v28, 14  ;;  %vm1110_vm4 = vcmask 7168   ;;  %vm1120_vm6 = vcmask 23552   ;;  %vm1129_vm7 = vcmask 39936  }
  0x38   :  { %1373 = vmatpush3.bf16.msra.mxu1 %v1370_v50 }
  0x39   :  { %1279 = vmatmul.mubr.msk.f32.vlgmr.msra.gmra.mrb[0].mxu0 %vm225_vm1, %v219_v32  ;;  %1375 = vmatprep.subr.bf16.mxu1 %v1374_v56 }
  0x3a   :  { %1281 = vmatprep.mubr.msk.f32.mxu0 %vm225_vm1, %v206_v33  ;;  %1353 = vmatpush3.bf16.msra.mxu0 %v1350_v38 }
  0x3b   :  { %1355 = vmatprep.subr.bf16.mxu0 %v1354_v42 }
  0x3c   :  { %1377 = vmatpush3.bf16.msra.mxu1 %v1374_v56 }
  0x3d   :  { %1282 = vmatmul.mubr.msk.f32.gmra.mrb[2].mxu0 %vm225_vm1, %v221_v35  ;;  %1379 = vmatprep.subr.bf16.mxu1 %v1378_v59 }
  0x3e   :  { %1357 = vmatpush3.bf16.msra.mxu0 %v1354_v42 }
  0x3f   :  { %1359 = vmatprep.subr.bf16.mxu0 %v1358_v48 }
  0x40   :  { %1381 = vmatpush3.bf16.msra.mxu1 %v1378_v59 }
  0x41   :  { %1383 = vmatprep.subr.bf16.mxu1 %v1635_v62 }
  0x42   :  { %1361 = vmatpush3.bf16.msra.mxu0 %v1358_v48 }
  0x43   :  { %1363 = vmatprep.subr.bf16.mxu0 %v1362_v54 }
  0x46   :  { %1365 = vmatpush3.bf16.msra.mxu0 %v1362_v54 }
 0x10c   :  { %v1280_v0 = vpop.f32.mrb[0].mxu0 }
 0x10d   :  { %v541_v2 = vadd.f32 %v1280_v0, %v1195_v63  ;;  %v510_v4 = vpop.f32.mrb[1].mxu0  ;;  %v841_v0 = vld [vmem:[#allocation2 + $0x90] sm:$0xff] }
 0x10e   :  { %v540_v5 = vadd.f32 %v1195_v63, %v510_v4 }
 0x10f   :  { %v545_v6 = vmax.f32 %v541_v2, 0.0  ;;  %v842_v2 = vld [vmem:[#allocation2 + $0x98] sm:$0xff] }
 0x110   :  { %v544_v7 = vmax.f32 %v540_v5, 0.0  ;;  %v1283_v8 = vpop.f32.mrb[2].mxu0  ;;  %v1386_v9 = vpack.c.bf16 %v842_v2, %v841_v0  ;;  %v1060_v2 = vld [vmem:[#allocation5 + $0xa0] sm:$0xff] }
 0x111   :  { %v549_v10 = vrot.slane %v545_v6, 1  ;;  %v561_v11 = vrot.slane %v545_v6, 7  ;;  %v543_v13 = vadd.f32 %v1283_v8, %v1195_v63  ;;  %v520_v14 = vpop.f32.mrb[3].mxu0 }
 0x112   :  { %v548_v15 = vrot.slane %v544_v7, 1  ;;  %v560_v16 = vrot.slane %v544_v7, 7  ;;  %v542_v17 = vadd.f32 %v1195_v63, %v520_v14 }
 0x113   :  { %v547_v19 = vmax.f32 %v543_v13, 0.0  ;;  %v844_v13 = vld [vmem:[#allocation2 + $0xa8] sm:$0xff] }
 0x114   :  { %v566_v23 = vsel %vm184_vm2, %v560_v16, %v561_v11  ;;  %v546_v24 = vmax.f32 %v542_v17, 0.0  ;;  %v554_v26 = vsel %vm205_vm5, %v548_v15, %v549_v10 }
 0x115   :  { %v551_v27 = vrot.slane %v547_v19, 1  ;;  %v563_v29 = vrot.slane %v547_v19, 7  ;;  %v556_v30 = vmax.f32 %v544_v7, %v554_v26  ;;  %v569_v31 = vmax.f32 %v545_v6, %v566_v23 }
 0x116   :  { %v550_v32 = vrot.slane %v546_v24, 1  ;;  %v562_v33 = vrot.slane %v546_v24, 7 }
 0x117   :  { %v567_v35 = vsel %vm184_vm2, %v563_v29, %v560_v16  ;;  %v555_v38 = vsel %vm205_vm5, %v551_v27, %v548_v15  ;;  %v845_v15 = vld [vmem:[#allocation2 + $0xb0] sm:$0xff]  ;;  %v846_v16 = vld [vmem:[#allocation2 + $0xb8] sm:$0xff] }
 0x118   :  { %v553_v39 = vsel %vm205_vm5, %v549_v10, %v550_v32  ;;  %v568_v40 = vmax.f32 %v544_v7, %v567_v35  ;;  %v552_v41 = vsel %vm205_vm5, %v550_v32, %v551_v27  ;;  %v565_v42 = vsel %vm184_vm2, %v561_v11, %v562_v33  ;;  %v843_v11 = vld [vmem:[#allocation2 + $0xa0] sm:$0xff] }
 0x119   :  { %v557_v43 = vmax.f32 %v545_v6, %v553_v39  ;;  %v558_v44 = vmax.f32 %v546_v24, %v552_v41  ;;  %v570_v45 = vmax.f32 %v546_v24, %v565_v42  ;;  %v559_v46 = vmax.f32 %v547_v19, %v555_v38 }
 0x11a   :  { %v580_v47 = vsel %vm1647_vm8, %v556_v30, %v568_v40  ;;  %v564_v48 = vsel %vm184_vm2, %v562_v33, %v563_v29  ;;  %v1390_v12 = vpack.c.bf16 %v844_v13, %v843_v11  ;;  %v1394_v17 = vpack.c.bf16 %v846_v16, %v845_v15 }
 0x11b   :  { %v584_v49 = vrot.slane %v580_v47, 6  ;;  %v605_v50 = vrot.slane %v580_v47, 2  ;;  %1300 = vmatprep.mubr.msk.f32.mxu0 %vm643_vm9, %v580_v47  ;;  %v581_v51 = vsel %vm1653_vm10, %v557_v43, %v569_v31  ;;  %v582_v52 = vsel %vm1659_vm11, %v558_v44, %v570_v45  ;;  %v992_v43 = vld [vmem:[#allocation5 + $0x20] sm:$0xff] }
 0x11c   :  { %1301 = vmatmul.mubr.msk.f32.vlgmr.msra.gmra.mrb[4].mxu0 %vm643_vm9, %v581_v51  ;;  %v586_v53 = vrot.slane %v582_v52, 6  ;;  %v607_v54 = vrot.slane %v582_v52, 2  ;;  %v571_v55 = vmax.f32 %v547_v19, %v564_v48  ;;  %v585_v56 = vrot.slane %v581_v51, 6  ;;  %v975_v44 = vld [vmem:[#allocation5] sm:$0xff] }
 0x11d   :  { %1303 = vmatprep.mubr.msk.f32.mxu0 %vm643_vm9, %v582_v52  ;;  %v606_v57 = vrot.slane %v581_v51, 2  ;;  %vm177_vm2 = vcmp.lt.s32.totalorder %v1609_v21, 14  ;;  %v1208_v21 = vld [vmem:[%s1812_s4] ss:$0 sm:$0xff]  ;;  %vm1115_vm5 = vcmask 15360   ;;  %vm1134_vm8 = vcmask 48128  }
 0x11e   :  { %v583_v58 = vsel %vm1663_vm12, %v559_v46, %v571_v55  ;;  %v591_v59 = vsel %vm588_vm13, %v584_v49, %v585_v56  ;;  %v590_v60 = vsel %vm588_vm13, %v585_v56, %v586_v53  ;;  %v1009_v55 = vld [vmem:[#allocation5 + $0x40] sm:$0xff]  ;;  %vm1144_vm10 = vcmask 64512  }
 0x11f   :  { %v587_v61 = vrot.slane %v583_v58, 6  ;;  %v608_v63 = vrot.slane %v583_v58, 2  ;;  %v612_v4 = vsel %vm609_vm14, %v605_v50, %v606_v57  ;;  %v611_v5 = vsel %vm609_vm14, %v606_v57, %v607_v54 }
 0x120   :  { %1304 = vmatmul.mubr.msk.f32.gmra.mrb[6].mxu0 %vm643_vm9, %v583_v58  ;;  %v603_v14 = vsel %vm174_vm0, %v590_v60, 0.0  ;;  %v623_v18 = vsel %vm177_vm2, %v611_v5, 0.0  ;;  %v1026_v60 = vld [vmem:[#allocation5 + $0x60] sm:$0xff] }
 0x121   :  { %v592_v6 = vsel %vm588_vm13, %v587_v61, %v584_v49  ;;  %v589_v7 = vsel %vm588_vm13, %v586_v53, %v587_v61  ;;  %v610_v3 = vsel %vm609_vm14, %v607_v54, %v608_v63  ;;  %v613_v10 = vsel %vm609_vm14, %v608_v63, %v605_v50  ;;  %v1043_v54 = vld [vmem:[#allocation5 + $0x80] sm:$0xff]  ;;  %v978_v61 = vld [vmem:[#allocation5 + $0x18] sm:$0xff] }
 0x122   :  { %v601_v8 = vsel %vm172_vm15, %v592_v6, 0.0  ;;  %v1077_v6 = vld [vmem:[#allocation5 + $0xc0] sm:$0xff] }
 0x123   :  { %1322 = vmatprep.mubr.msk.f32.mxu1 %vm643_vm9, %v601_v8 }
 0x124   :  { %1323 = vmatmul.mubr.msk.f32.vlgmr.msra.gmra.mrb[0].mxu1 %vm643_vm9, %v591_v59 }
 0x125   :  { %1385 = vmatpush3.bf16.msra.mxu1 %v1635_v62  ;;  %1325 = vmatprep.mubr.msk.f32.mxu1 %vm643_vm9, %v603_v14  ;;  %v625_v62 = vsel %vm179_vm3, %v613_v10, 0.0  ;;  %v994_v10 = vld [vmem:[#allocation5 + $0x30] sm:$0xff]  ;;  %v995_v14 = vld [vmem:[#allocation5 + $0x38] sm:$0xff] }
 0x126   :  { %1387 = vmatprep.subr.bf16.mxu1 %v1386_v9 }
 0x128   :  { %1326 = vmatmul.mubr.msk.f32.gmra.mrb[2].mxu1 %vm643_vm9, %v589_v7  ;;  %v1010_v7 = vld [vmem:[#allocation5 + $0x48] sm:$0xff] }
 0x129   :  { %1389 = vmatpush3.bf16.msra.mxu1 %v1386_v9  ;;  %1344 = vmatprep.mubr.msk.f32.mxu1 %vm643_vm9, %v612_v4  ;;  %v1094_v9 = vld [vmem:[#allocation5 + $0xe0] sm:$0xff] }
 0x12a   :  { %1391 = vmatprep.subr.bf16.mxu1 %v1390_v12 }
 0x12d   :  { %1393 = vmatpush3.bf16.msra.mxu1 %v1390_v12  ;;  %v1027_v12 = vld [vmem:[#allocation5 + $0x68] sm:$0xff] }
 0x12e   :  { %1395 = vmatprep.subr.bf16.mxu1 %v1394_v17 }
 0x131   :  { %1397 = vmatpush3.bf16.msra.mxu1 %v1394_v17  ;;  %v1012_v17 = vld [vmem:[#allocation5 + $0x58] sm:$0xff] }
 0x134   :  { %1345 = vmatmul.mubr.msk.f32.vlgmr.msra.gmra.mrb[0].mxu1 %vm643_vm9, %v623_v18  ;;  %v1028_v18 = vld [vmem:[#allocation5 + $0x70] sm:$0xff] }
 0x135   :  { %1347 = vmatprep.mubr.msk.f32.mxu1 %vm643_vm9, %v610_v3 }
 0x138   :  { %1348 = vmatmul.mubr.msk.f32.gmra.mrb[2].mxu1 %vm643_vm9, %v625_v62  ;;  %vm1139_vm9 = vcmask 56320  }
 0x1ef   :  { %v1302_v19 = vpop.f32.mrb[4].mxu0 }
 0x1f0   :  { %v722_v20 = vpop.f32.mrb[5].mxu0 }
 0x1f3   :  { %v1305_v22 = vpop.f32.mrb[6].mxu0 }
 0x1f4   :  { %v732_v23 = vpop.f32.mrb[7].mxu0 }
 0x207   :  { %v1346_v24 = vpop.f32.mrb[0].mxu1 }
 0x208   :  { %v1398_v25 = vadd.f32 %v1346_v24, %v1302_v19  ;;  %v925_v26 = vpop.f32.mrb[1].mxu1 }
 0x209   :  { %v1399_v27 = vadd.f32 %v925_v26, %v722_v20  ;;  %v1029_v20 = vld [vmem:[#allocation5 + $0x78] sm:$0xff] }
 0x20a   :  { %v956_v29 = vadd.f32 %v1398_v25, %v1208_v21  ;;  %v1045_v25 = vld [vmem:[#allocation5 + $0x90] sm:$0xff] }
 0x20b   :  { %v955_v30 = vadd.f32 %v1399_v27, %v1208_v21  ;;  %v1349_v28 = vpop.f32.mrb[2].mxu1 }
 0x20c   :  { %v960_v31 = vmax.f32 %v956_v29, 0.0  ;;  %v1400_v32 = vadd.f32 %v1349_v28, %v1305_v22  ;;  %v935_v33 = vpop.f32.mrb[3].mxu1  ;;  %v1061_v22 = vld [vmem:[#allocation5 + $0xa8] sm:$0xff] }
 0x20d   :  { %v959_v34 = vmax.f32 %v955_v30, 0.0  ;;  %v1401_v35 = vadd.f32 %v935_v33, %v732_v23  ;;  %v976_v29 = vld [vmem:[#allocation5 + $0x8] sm:$0xff]  ;;  %v977_v33 = vld [vmem:[#allocation5 + $0x10] sm:$0xff] }
 0x20e   :  { %v964_v36 = vrot.slane %v960_v31, 2  ;;  %v958_v37 = vadd.f32 %v1400_v32, %v1208_v21  ;;  %v1078_v30 = vld [vmem:[#allocation5 + $0xc8] sm:$0xff]  ;;  %v1062_v32 = vld [vmem:[#allocation5 + $0xb0] sm:$0xff] }
 0x20f   :  { %v963_v38 = vrot.slane %v959_v34, 2  ;;  %v957_v39 = vadd.f32 %v1401_v35, %v1208_v21  ;;  %v1046_v21 = vld [vmem:[#allocation5 + $0x98] sm:$0xff] }
 0x210   :  { %v962_v40 = vmax.f32 %v958_v37, 0.0  ;;  %v1011_v37 = vld [vmem:[#allocation5 + $0x50] sm:$0xff] }
 0x211   :  { %v969_v41 = vsel %vm609_vm14, %v963_v38, %v964_v36  ;;  %v961_v42 = vmax.f32 %v957_v39, 0.0 }
 0x212   :  { %v971_v45 = vmax.f32 %v959_v34, %v969_v41  ;;  %v966_v46 = vrot.slane %v962_v40, 2  ;;  %v1044_v41 = vld [vmem:[#allocation5 + $0x88] sm:$0xff] }
 0x213   :  { %v965_v47 = vrot.slane %v961_v42, 2 }
 0x214   :  { %v970_v48 = vsel %vm609_vm14, %v966_v46, %v963_v38  ;;  %v996_v49 = vmul.f32 %v992_v43, %v971_v45  ;;  %v979_v50 = vmul.f32 %v975_v44, %v971_v45  ;;  %v1047_v58 = vmul.f32 %v1043_v54, %v971_v45  ;;  %v1096_v44 = vld [vmem:[#allocation5 + $0xf0] sm:$0xff] }
 0x215   :  { %v1727_v51 = vmax.f32 %v962_v40, %v970_v48  ;;  %v967_v52 = vsel %vm609_vm14, %v965_v47, %v966_v46  ;;  %v968_v53 = vsel %vm609_vm14, %v964_v36, %v965_v47  ;;  %v1013_v59 = vmul.f32 %v1009_v55, %v971_v45  ;;  %v1095_v36 = vld [vmem:[#allocation5 + $0xe8] sm:$0xff]  ;;  %v1079_v40 = vld [vmem:[#allocation5 + $0xd0] sm:$0xff]  ;;  %v1097_v48 = vld [vmem:[#allocation5 + $0xf8] sm:$0xff] }
 0x216   :  { %v1733_v56 = vmax.f32 %v960_v31, %v968_v53  ;;  %v1735_v57 = vmax.f32 %v961_v42, %v967_v52  ;;  %1000 = vadd.xlane.f32.xlu1 %v996_v49  ;;  %983 = vadd.xlane.f32.xlu0 %v979_v50  ;;  %v1030_v63 = vmul.f32 %v1026_v60, %v971_v45  ;;  %v1080_v49 = vld [vmem:[#allocation5 + $0xd8] sm:$0xff] }
 0x217   :  { %v982_v0 = vmul.f32 %v978_v61, %v1727_v51  ;;  %v1064_v4 = vmul.f32 %v1060_v2, %v971_v45  ;;  %v1081_v3 = vmul.f32 %v1077_v6, %v971_v45  ;;  %v1098_v11 = vmul.f32 %v1094_v9, %v971_v45  ;;  %v1063_v45 = vld [vmem:[#allocation5 + $0xb8] sm:$0xff] }
 0x218   :  { %v997_v5 = vmul.f32 %v993_v1, %v1733_v56  ;;  %v1014_v8 = vmul.f32 %v1010_v7, %v1733_v56  ;;  %v998_v13 = vmul.f32 %v994_v10, %v1735_v57  ;;  %v999_v15 = vmul.f32 %v995_v14, %v1727_v51 }
 0x219   :  { %v1031_v16 = vmul.f32 %v1027_v12, %v1733_v56  ;;  %v1016_v62 = vmul.f32 %v1012_v17, %v1727_v51  ;;  %v1032_v19 = vmul.f32 %v1028_v18, %v1735_v57  ;;  %v1033_v23 = vmul.f32 %v1029_v20, %v1727_v51 }
 0x21a   :  { %1051 = vadd.xlane.f32.xlu1 %v1047_v58  ;;  %1017 = vadd.xlane.f32.xlu0 %v1013_v59  ;;  %v1065_v24 = vmul.f32 %v1061_v22, %v1733_v56  ;;  %v1050_v26 = vmul.f32 %v1046_v21, %v1727_v51  ;;  %v1049_v27 = vmul.f32 %v1045_v25, %v1735_v57 }
 0x21b   :  { %v980_v28 = vmul.f32 %v976_v29, %v1733_v56  ;;  %v1082_v31 = vmul.f32 %v1078_v30, %v1733_v56  ;;  %v1066_v34 = vmul.f32 %v1062_v32, %v1735_v57  ;;  %v981_v35 = vmul.f32 %v977_v33, %v1735_v57 }
 0x21c   :  { %v1099_v38 = vmul.f32 %v1095_v36, %v1733_v56  ;;  %v1015_v39 = vmul.f32 %v1011_v37, %v1735_v57  ;;  %v1083_v42 = vmul.f32 %v1079_v40, %v1735_v57  ;;  %v1048_v43 = vmul.f32 %v1044_v41, %v1733_v56 }
 0x21d   :  { %v1100_v46 = vmul.f32 %v1096_v44, %v1735_v57  ;;  %v1067_v47 = vmul.f32 %v1063_v45, %v1727_v51  ;;  %v1101_v50 = vmul.f32 %v1097_v48, %v1727_v51  ;;  %v1084_v52 = vmul.f32 %v1080_v49, %v1727_v51 }
 0x21e   :  { %1034 = vadd.xlane.f32.xlu0 %v1030_v63  ;;  %989 = vadd.xlane.f32.xlu1 %v982_v0 }
 0x222   :  { %1068 = vadd.xlane.f32.xlu0 %v1064_v4  ;;  %1002 = vadd.xlane.f32.xlu1 %v997_v5 }
 0x226   :  { %1085 = vadd.xlane.f32.xlu0 %v1081_v3  ;;  %1019 = vadd.xlane.f32.xlu1 %v1014_v8 }
 0x22a   :  { %1102 = vadd.xlane.f32.xlu0 %v1098_v11  ;;  %1004 = vadd.xlane.f32.xlu1 %v998_v13 }
 0x22e   :  { %1006 = vadd.xlane.f32.xlu0 %v999_v15  ;;  %1036 = vadd.xlane.f32.xlu1 %v1031_v16 }
 0x232   :  { %1023 = vadd.xlane.f32.xlu0 %v1016_v62  ;;  %1038 = vadd.xlane.f32.xlu1 %v1032_v19 }
 0x236   :  { %1040 = vadd.xlane.f32.xlu0 %v1033_v23  ;;  %1070 = vadd.xlane.f32.xlu1 %v1065_v24 }
 0x23a   :  { %1057 = vadd.xlane.f32.xlu0 %v1050_v26  ;;  %1055 = vadd.xlane.f32.xlu1 %v1049_v27 }
 0x23e   :  { %985 = vadd.xlane.f32.xlu0 %v980_v28  ;;  %1087 = vadd.xlane.f32.xlu1 %v1082_v31 }
 0x242   :  { %1072 = vadd.xlane.f32.xlu1 %v1066_v34  ;;  %987 = vadd.xlane.f32.xlu0 %v981_v35 }
 0x246   :  { %1104 = vadd.xlane.f32.xlu1 %v1099_v38  ;;  %1021 = vadd.xlane.f32.xlu0 %v1015_v39 }
 0x24a   :  { %1089 = vadd.xlane.f32.xlu1 %v1083_v42  ;;  %1053 = vadd.xlane.f32.xlu0 %v1048_v43 }
 0x24e   :  { %1106 = vadd.xlane.f32.xlu1 %v1100_v46  ;;  %1074 = vadd.xlane.f32.xlu0 %v1067_v47 }
 0x252   :  { %1108 = vadd.xlane.f32.xlu1 %v1101_v50  ;;  %1091 = vadd.xlane.f32.xlu0 %v1084_v52 }
 0x2a3   :  { %v1001_v53 = vpop.xlane.xlu1 %1000  ;;  %v984_v54 = vpop.xlane.xlu0 %983 }
 0x2a4   :  { %v1111_v14 = vsel %vm1110_vm4, %v984_v54, %v1001_v53 }
 0x2a7   :  { %v1052_v55 = vpop.xlane.xlu1 %1051  ;;  %v1018_v56 = vpop.xlane.xlu0 %1017 }
 0x2a8   :  { %v1116_v15 = vsel %vm1115_vm5, %v1111_v14, %v1018_v56 }
 0x2ab   :  { %v1035_v58 = vpop.xlane.xlu0 %1034  ;;  %v990_v59 = vpop.xlane.xlu1 %989 }
 0x2ac   :  { %v1121_v16 = vsel %vm1120_vm6, %v1116_v15, %v1035_v58 }
 0x2ad   :  { %v1125_v23 = vsel %vm225_vm1, %v1121_v16, %v1052_v55 }
 0x2af   :  { %v1069_v60 = vpop.xlane.xlu0 %1068  ;;  %v1003_v57 = vpop.xlane.xlu1 %1002 }
 0x2b0   :  { %v1130_v21 = vsel %vm1129_vm7, %v1125_v23, %v1069_v60 }
 0x2b3   :  { %v1086_v61 = vpop.xlane.xlu0 %1085  ;;  %v1020_v63 = vpop.xlane.xlu1 %1019 }
 0x2b4   :  { %v1135_v29 = vsel %vm1134_vm8, %v1130_v21, %v1086_v61  ;;  %v1158_v61 = vld [vmem:[%s1814_s6] sm:$0x1] }
 0x2b7   :  { %v1103_v0 = vpop.xlane.xlu0 %1102  ;;  %v1005_v2 = vpop.xlane.xlu1 %1004 }
 0x2b8   :  { %v1140_v31 = vsel %vm1139_vm9, %v1135_v29, %v1103_v0 }
 0x2b9   :  { %v1145_v39 = vsel %vm1144_vm10, %v1140_v31, 0.0 }
 0x2bb   :  { %v1007_v1 = vpop.xlane.xlu0 %1006  ;;  %v1037_v4 = vpop.xlane.xlu1 %1036 }
 0x2bc   :  { %v1114_v34 = vsel %vm1110_vm4, %v990_v59, %v1007_v1 }
 0x2bf   :  { %v1024_v5 = vpop.xlane.xlu0 %1023  ;;  %v1039_v6 = vpop.xlane.xlu1 %1038 }
 0x2c0   :  { %v1119_v40 = vsel %vm1115_vm5, %v1114_v34, %v1024_v5 }
 0x2c3   :  { %v1041_v7 = vpop.xlane.xlu0 %1040  ;;  %v1071_v51 = vpop.xlane.xlu1 %1070 }
 0x2c4   :  { %v1124_v43 = vsel %vm1120_vm6, %v1119_v40, %v1041_v7 }
 0x2c7   :  { %v1058_v3 = vpop.xlane.xlu0 %1057  ;;  %v1056_v8 = vpop.xlane.xlu1 %1055 }
 0x2c8   :  { %v1128_v45 = vsel %vm225_vm1, %v1124_v43, %v1058_v3 }
 0x2cb   :  { %v986_v9 = vpop.xlane.xlu0 %985  ;;  %v1088_v10 = vpop.xlane.xlu1 %1087 }
 0x2cc   :  { %v1112_v12 = vsel %vm1110_vm4, %v986_v9, %v1003_v57 }
 0x2cd   :  { %v1117_v19 = vsel %vm1115_vm5, %v1112_v12, %v1020_v63 }
 0x2ce   :  { %v1122_v26 = vsel %vm1120_vm6, %v1117_v19, %v1037_v4 }
 0x2cf   :  { %v1073_v11 = vpop.xlane.xlu1 %1072  ;;  %v988_v13 = vpop.xlane.xlu0 %987 }
 0x2d0   :  { %v1113_v17 = vsel %vm1110_vm4, %v988_v13, %v1005_v2 }
 0x2d3   :  { %v1105_v18 = vpop.xlane.xlu1 %1104  ;;  %v1022_v62 = vpop.xlane.xlu0 %1021 }
 0x2d4   :  { %v1118_v20 = vsel %vm1115_vm5, %v1113_v17, %v1022_v62 }
 0x2d5   :  { %v1123_v22 = vsel %vm1120_vm6, %v1118_v20, %v1039_v6 }
 0x2d6   :  { %v1127_v24 = vsel %vm225_vm1, %v1123_v22, %v1056_v8 }
 0x2d7   :  { %v1090_v25 = vpop.xlane.xlu1 %1089  ;;  %v1054_v27 = vpop.xlane.xlu0 %1053  ;;  %v1132_v30 = vsel %vm1129_vm7, %v1127_v24, %v1073_v11 }
 0x2d8   :  { %v1126_v28 = vsel %vm225_vm1, %v1122_v26, %v1054_v27  ;;  %v1137_v35 = vsel %vm1134_vm8, %v1132_v30, %v1090_v25  ;;  %vm1160_vm1 = vcmask 57344  }
 0x2d9   :  { %v1131_v32 = vsel %vm1129_vm7, %v1126_v28, %v1071_v51 }
 0x2da   :  { %v1136_v33 = vsel %vm1134_vm8, %v1131_v32, %v1088_v10 }
 0x2db   :  { %v1107_v36 = vpop.xlane.xlu1 %1106  ;;  %v1141_v37 = vsel %vm1139_vm9, %v1136_v33, %v1105_v18  ;;  %v1075_v38 = vpop.xlane.xlu0 %1074 }
 0x2dc   :  { %v1142_v41 = vsel %vm1139_vm9, %v1137_v35, %v1107_v36  ;;  %v1146_v42 = vsel %vm1144_vm10, %v1141_v37, 0.0  ;;  %v1133_v47 = vsel %vm1129_vm7, %v1128_v45, %v1075_v38 }
 0x2dd   :  { %v1147_v44 = vadd.f32 %v1146_v42, %v1145_v39  ;;  %v1148_v46 = vsel %vm1144_vm10, %v1142_v41, 0.0 }
 0x2df   :  { %v1109_v48 = vpop.xlane.xlu1 %1108  ;;  %v1092_v49 = vpop.xlane.xlu0 %1091  ;;  %v1149_v52 = vadd.f32 %v1148_v46, %v1147_v44 }
 0x2e0   :  { %v1138_v50 = vsel %vm1134_vm8, %v1133_v47, %v1092_v49 }
 0x2e1   :  { %v1143_v53 = vsel %vm1139_vm9, %v1138_v50, %v1109_v48 }
 0x2e2   :  { %v1150_v54 = vsel %vm1144_vm10, %v1143_v53, 0.0 }
 0x2e3   :  { %v1151_v55 = vadd.f32 %v1150_v54, %v1149_v52 }
 0x2e5   :  { %v1152_v56 = vrot.slane %v1151_v55, 4 }
 0x2e7   :  { %v1153_v58 = vadd.f32 %v1152_v56, %v1151_v55 }
 0x2e9   :  { %v1154_v59 = vrot.slane %v1153_v58, 2 }
 0x2eb   :  { %v1155_v60 = vadd.f32 %v1154_v59, %v1153_v58 }
 0x2ed   :  { %v1156_v57 = vrot.slane %v1155_v60, 1 }
 0x2ef   :  { %v1157_v63 = vadd.f32 %v1156_v57, %v1155_v60 }
 0x2f1   :  { %v1159_v0 = vadd.f32 %v1158_v61, %v1157_v63 }
 0x2f3   :  { %1161 = vst.msk [vmem:[#allocation7] sm:$0x1] %vm1160_vm1, %v1159_v0 }
 0x2f4   :  { %1474 = shalt.err (!%p1471_p6)
}
 0x2f5   :  { %s1475_s24 = scalar_lea.hbm %s1815_s7, 16 }
 0x2f6   :  { %p1476_p7 = scmp.ne.s32.totalorder %s1815_s7, %s1475_s24  ;;  %p1479_p8 = scmp.lt.u32.totalorder %s1475_s24, %s1815_s7 }
 0x2f8   :  { %p1481_p9 = pnand %p1479_p8, %p1476_p7 }
 0x2fa   :  { %1484 = shalt.err (!%p1481_p9)
}
 0x2fb   :  { %1171 = dma.vmem_to_hbm [thread:$0]  %s1169_s19, 16, %s1815_s7, [#allocation4]  }
 0x2fc   :  { %1489 = dma.done.wait [#allocation4], 16  }
 0x2fd   :  { %1490 = vsyncadd [#allocation4], 4294967280 }
 0x2fe   :  { %1175 = vsyncpa [#allocation3], 1 }
 0x2ff   :  { %1176 = vsyncpa [#allocation6], 1 }
 0x300   :  { %1177 = vsyncpa [#allocation4], 1 }

</bundles_post_ra>
